<compile_context>
chip_gen: v7x
topology: tpu7x:2x2x1
jax: 0.10.0
libtpu: 0.0.40
codegen_flags: <defaults>
</compile_context>

<pallas_src>
import functools

import jax
import jax.numpy as jnp
import numpy as np
from jax import lax
from jax.experimental import pallas as pl
from jax.experimental.pallas import tpu as pltpu

BN_EPS = 1e-5
_LANE = 128


def _round_up(x, mult):
    return -(-x // mult) * mult


def _fused_kernel(p_ref, w_ref, g_ref, b_ref, o_ref,
                  s1_ref, s2_ref, sc_ref, sh_ref, *, inv_m, eps):
    """2-phase fused conv + batch-norm(train) + ReLU over one M-tile.

    p_ref:  [TM, K]  bf16 im2col patch tile (read in both phases)
    w_ref:  [K, Cp]  bf16 weight matrix (resident)
    g_ref:  [1, Cp]  f32 gamma,  b_ref: [1, Cp] f32 beta (resident)
    o_ref:  [TM, Cp] f32 output tile (written in phase 1 only)
    s1/s2:  [1, Cp]  f32 VMEM scratch: running sum(y) / sum(y^2)
    sc/sh:  [1, Cp]  f32 VMEM scratch: folded BN scale / shift
    """
    phase = pl.program_id(0)
    i = pl.program_id(1)

    # Conv as a single MXU matmul (bf16 operands, f32 accumulation).  Computed in both
    # phases: phase 1 recomputes instead of reading a stored f32 intermediate from HBM.
    y = jnp.dot(p_ref[...], w_ref[...], preferred_element_type=jnp.float32)

    # ---- phase 0: batch-statistics sweep ----
    @pl.when((phase == 0) & (i == 0))
    def _init_stats():
        s1_ref[...] = jnp.zeros_like(s1_ref)
        s2_ref[...] = jnp.zeros_like(s2_ref)

    @pl.when(phase == 0)
    def _accumulate_stats():
        # Zero-padded rows contribute 0 to both sums -> dividing by the real M is exact.
        s1_ref[...] += jnp.sum(y, axis=0, keepdims=True)
        s2_ref[...] += jnp.sum(y * y, axis=0, keepdims=True)

    # ---- phase 1, first tile: fold mean/var/gamma/beta into scale & shift ----
    @pl.when((phase == 1) & (i == 0))
    def _fold_bn():
        mean = s1_ref[...] * inv_m
        var = jnp.maximum(s2_ref[...] * inv_m - mean * mean, 0.0)  # clamp cancellation
        scale = g_ref[...] * lax.rsqrt(var + eps)
        sc_ref[...] = scale
        sh_ref[...] = b_ref[...] - mean * scale

    # ---- phase 1: normalize + ReLU, write output ----
    @pl.when(phase == 1)
    def _apply():
        o_ref[...] = jnp.maximum(
            y * sc_ref[...] + sh_ref[...], 0.0
        ).astype(o_ref.dtype)


@functools.partial(jax.jit, static_argnames=("kernel_size", "tile_m"))
def conv_norm_relu(x_nchw, w, b, gamma, beta, *, kernel_size, tile_m=512):
    """Forward pass of ConvNormRelu (dropout=False, BN train mode).

    x_nchw: [N, Cin, H, W] (PyTorch NCHW), w: [Cout, Cin, KH, KW], b/gamma/beta: [Cout]
    returns [N, Cout, OH, OW] float32.
    """
    del b  # conv bias cancels exactly under train-mode BatchNorm (y - mean(y))
    kh, kw = kernel_size
    n, cin, h, wd = x_nchw.shape
    cout = w.shape[0]
    oh, ow = h - kh + 1, wd - kw + 1
    m = n * oh * ow
    k = kh * kw * cin

    # ---- im2col in bf16 (feature order: Cin slowest, then KH, KW) ----
    # TODO(synk): move im2col fully into the kernel (manual row-band DMA + in-VMEM patch
    #             assembly) to avoid the KH*KW-expanded HBM intermediate.
    patches = lax.conv_general_dilated_patches(
        x_nchw.astype(jnp.bfloat16), (kh, kw), (1, 1), "VALID",
        dimension_numbers=("NCHW", "OIHW", "NHWC"),
    ).reshape(m, k)                                       # [M, K]

    # weight [Cout, Cin, KH, KW] -> [K, Cout] matching the patch feature order
    w_mat = w.reshape(cout, k).T.astype(jnp.bfloat16)

    # ---- tiling (K untiled: full-K blocks are exempt from the 128 rule) ----
    cp = _round_up(max(cout, _LANE), _LANE)               # lane-dense output channels
    tm = min(tile_m, _round_up(m, 8))
    mp = _round_up(m, tm)
    grid_m = mp // tm

    patches_p = jnp.pad(patches, ((0, mp - m), (0, 0)))   # zero rows -> 0 in the stats
    w_p = jnp.pad(w_mat, ((0, 0), (0, cp - cout)))
    gamma_p = jnp.pad(gamma.astype(jnp.float32)[None, :], ((0, 0), (0, cp - cout)))
    beta_p = jnp.pad(beta.astype(jnp.float32)[None, :], ((0, 0), (0, cp - cout)))

    kernel = functools.partial(_fused_kernel, inv_m=1.0 / m, eps=BN_EPS)

    out = pl.pallas_call(
        kernel,
        out_shape=jax.ShapeDtypeStruct((mp, cp), jnp.float32),
        grid_spec=pltpu.PrefetchScalarGridSpec(
            num_scalar_prefetch=0,
            grid=(2, grid_m),                             # (phase, M tile)
            in_specs=[
                pl.BlockSpec((tm, k), lambda p, i: (i, 0)),    # patches (both phases)
                pl.BlockSpec((k, cp), lambda p, i: (0, 0)),    # weights (resident)
                pl.BlockSpec((1, cp), lambda p, i: (0, 0)),    # gamma   (resident)
                pl.BlockSpec((1, cp), lambda p, i: (0, 0)),    # beta    (resident)
            ],
            # Phase 0 keeps the output block index pinned at 0 (never written, never
            # flushed); phase 1 streams tiles 0..grid_m-1, each written back exactly once.
            out_specs=pl.BlockSpec((tm, cp), lambda p, i: (i * p, 0)),
            scratch_shapes=[
                pltpu.VMEM((1, cp), jnp.float32),         # sum(y)
                pltpu.VMEM((1, cp), jnp.float32),         # sum(y^2)
                pltpu.VMEM((1, cp), jnp.float32),         # scale
                pltpu.VMEM((1, cp), jnp.float32),         # shift
            ],
        ),
        compiler_params=pltpu.CompilerParams(
            # phase 1 depends on phase 0's stats and the stats accumulate across M tiles
            # -> both axes sequential.
            dimension_semantics=("arbitrary", "arbitrary"),
        ),
    )(patches_p, w_p, gamma_p, beta_p)

    # ---- rows -> NCHW output ----
    out = out[:m, :cout].reshape(n, oh, ow, cout)
    return jnp.transpose(out, (0, 3, 1, 2))


def _reference(x_nchw, w, b, gamma, beta):
    """Plain-JAX f32 reference of the PyTorch forward (dropout=False, BN train mode)."""
    y = lax.conv_general_dilated(
        x_nchw.astype(jnp.float32), w.astype(jnp.float32),
        window_strides=(1, 1), padding="VALID",
        dimension_numbers=("NCHW", "OIHW", "NCHW"),
    ) + b[None, :, None, None]
    mean = jnp.mean(y, axis=(0, 2, 3), keepdims=True)
    var = jnp.mean((y - mean) ** 2, axis=(0, 2, 3), keepdims=True)
    y_hat = (y - mean) * lax.rsqrt(var + BN_EPS)
    return jnp.maximum(y_hat * gamma[None, :, None, None] + beta[None, :, None, None], 0.0)


if __name__ == "__main__":
    # Small shapes consistent with the module: batch=2, in_channels=4,
    # out_channels=8, kernel_size=3, spatial=16x16.
    N, CIN, H, W = 2, 4, 16, 16
    COUT, KH, KW = 8, 3, 3

    key = jax.random.PRNGKey(0)
    kx, kw_, kb, kg, kbe = jax.random.split(key, 5)

    x = jax.random.normal(kx, (N, CIN, H, W), dtype=jnp.float32)
    conv_w = 0.1 * jax.random.normal(kw_, (COUT, CIN, KH, KW), dtype=jnp.float32)
    conv_b = 0.1 * jax.random.normal(kb, (COUT,), dtype=jnp.float32)
    bn_gamma = 1.0 + 0.1 * jax.random.normal(kg, (COUT,), dtype=jnp.float32)
    bn_beta = 0.1 * jax.random.normal(kbe, (COUT,), dtype=jnp.float32)
    # TODO(synk): dropout branch (dropout=True) not implemented; module default is dropout=False.

    out = conv_norm_relu(x, conv_w, conv_b, bn_gamma, bn_beta, kernel_size=(KH, KW))
    out = jax.block_until_ready(out)

    ref = jax.block_until_ready(_reference(x, conv_w, conv_b, bn_gamma, bn_beta))
    assert out.shape == (N, COUT, H - KH + 1, W - KW + 1)
    # bf16 MXU operands (f32 accumulation) -> loose tolerance vs the f32 reference.
    np.testing.assert_allclose(np.asarray(out), np.asarray(ref), rtol=2e-2, atol=2e-2)

    print("KERNEL_OK")
</pallas_src>

<mosaic_0001>
module attributes {stable_mosaic.version = 11 : i64} {
  func.func @_fused_kernel(%arg0: i32, %arg1: i32, %arg2: memref<392x36xbf16, #tpu.memory_space<vmem>>, %arg3: memref<36x128xbf16, #tpu.memory_space<vmem>>, %arg4: memref<1x128xf32, #tpu.memory_space<vmem>>, %arg5: memref<1x128xf32, #tpu.memory_space<vmem>>, %arg6: memref<392x128xf32, #tpu.memory_space<vmem>>, %arg7: memref<1x128xf32, #tpu.memory_space<vmem>>, %arg8: memref<1x128xf32, #tpu.memory_space<vmem>>, %arg9: memref<1x128xf32, #tpu.memory_space<vmem>>, %arg10: memref<1x128xf32, #tpu.memory_space<vmem>>) attributes {dimension_semantics = [#tpu.dimension_semantics<arbitrary>, #tpu.dimension_semantics<arbitrary>], iteration_bounds = array<i64: 2, 1>, scalar_prefetch = 0 : i64, scratch_operands = 4 : i64, tpu.core_type = #tpu.core_type<tc>, window_params = [{transform_indices = @transform_0, window_bounds = array<i64: 392, 36>}, {pipeline_mode = #tpu.pipeline_mode<synchronous>, transform_indices = @transform_1, window_bounds = array<i64: 36, 128>}, {pipeline_mode = #tpu.pipeline_mode<synchronous>, transform_indices = @transform_2, window_bounds = array<i64: 1, 128>}, {pipeline_mode = #tpu.pipeline_mode<synchronous>, transform_indices = @transform_3, window_bounds = array<i64: 1, 128>}, {transform_indices = @transform_4, window_bounds = array<i64: 392, 128>}]} {
    %c0 = arith.constant 0 : index
    %c0_0 = arith.constant 0 : index
    %0 = vector.load %arg2[%c0, %c0_0] : memref<392x36xbf16, #tpu.memory_space<vmem>>, vector<392x36xbf16>
    %c0_1 = arith.constant 0 : index
    %c0_2 = arith.constant 0 : index
    %1 = vector.load %arg3[%c0_1, %c0_2] : memref<36x128xbf16, #tpu.memory_space<vmem>>, vector<36x128xbf16>
    %cst = arith.constant dense<0.000000e+00> : vector<392x128xf32>
    %2 = tpu.matmul %0, %1, %cst {dimension_numbers = #tpu.dot_dimension_numbers<[1], [0], [0], [1], [0, 0, 1, 1], [], []>} : vector<392x36xbf16>, vector<36x128xbf16>, vector<392x128xf32> -> vector<392x128xf32>
    %c0_i32 = arith.constant 0 : i32
    %3 = arith.cmpi eq, %arg0, %c0_i32 : i32
    %c0_i32_3 = arith.constant 0 : i32
    %4 = arith.cmpi eq, %arg1, %c0_i32_3 : i32
    %5 = arith.andi %3, %4 : i1
    %6 = arith.extui %5 : i1 to i32
    %c0_i32_4 = arith.constant 0 : i32
    %7 = arith.cmpi ne, %6, %c0_i32_4 : i32
    scf.if %7 {
      %cst_11 = arith.constant 0.000000e+00 : f32
      %19 = vector.broadcast %cst_11 : f32 to vector<1x128xf32>
      %c0_12 = arith.constant 0 : index
      %c0_13 = arith.constant 0 : index
      %20 = vector.load %arg7[%c0_12, %c0_13] : memref<1x128xf32, #tpu.memory_space<vmem>>, vector<1x128xf32>
      tpu.vector_store %arg7[%c0_12, %c0_13], %19 {strides = array<i32>} : memref<1x128xf32, #tpu.memory_space<vmem>>, vector<1x128xf32>,
      %cst_14 = arith.constant 0.000000e+00 : f32
      %21 = vector.broadcast %cst_14 : f32 to vector<1x128xf32>
      %c0_15 = arith.constant 0 : index
      %c0_16 = arith.constant 0 : index
      %22 = vector.load %arg8[%c0_15, %c0_16] : memref<1x128xf32, #tpu.memory_space<vmem>>, vector<1x128xf32>
      tpu.vector_store %arg8[%c0_15, %c0_16], %21 {strides = array<i32>} : memref<1x128xf32, #tpu.memory_space<vmem>>, vector<1x128xf32>,
    } else {
    }
    %c0_i32_5 = arith.constant 0 : i32
    %8 = arith.cmpi eq, %arg0, %c0_i32_5 : i32
    %9 = arith.extui %8 : i1 to i32
    %c0_i32_6 = arith.constant 0 : i32
    %10 = arith.cmpi ne, %9, %c0_i32_6 : i32
    scf.if %10 {
      %c0_11 = arith.constant 0 : index
      %c0_12 = arith.constant 0 : index
      %19 = vector.load %arg7[%c0_11, %c0_12] : memref<1x128xf32, #tpu.memory_space<vmem>>, vector<1x128xf32>
      %cst_13 = arith.constant dense<0.000000e+00> : vector<128xf32>
      %20 = vector.multi_reduction <add>, %2, %cst_13 [0] : vector<392x128xf32> to vector<128xf32>
      %21 = vector.shape_cast %20 : vector<128xf32> to vector<1x128xf32>
      %22 = arith.addf %19, %21 : vector<1x128xf32>
      %c0_14 = arith.constant 0 : index
      %c0_15 = arith.constant 0 : index
      %23 = vector.load %arg7[%c0_14, %c0_15] : memref<1x128xf32, #tpu.memory_space<vmem>>, vector<1x128xf32>
      tpu.vector_store %arg7[%c0_14, %c0_15], %22 {strides = array<i32>} : memref<1x128xf32, #tpu.memory_space<vmem>>, vector<1x128xf32>,
      %c0_16 = arith.constant 0 : index
      %c0_17 = arith.constant 0 : index
      %24 = vector.load %arg8[%c0_16, %c0_17] : memref<1x128xf32, #tpu.memory_space<vmem>>, vector<1x128xf32>
      %25 = arith.mulf %2, %2 : vector<392x128xf32>
      %cst_18 = arith.constant dense<0.000000e+00> : vector<128xf32>
      %26 = vector.multi_reduction <add>, %25, %cst_18 [0] : vector<392x128xf32> to vector<128xf32>
      %27 = vector.shape_cast %26 : vector<128xf32> to vector<1x128xf32>
      %28 = arith.addf %24, %27 : vector<1x128xf32>
      %c0_19 = arith.constant 0 : index
      %c0_20 = arith.constant 0 : index
      %29 = vector.load %arg8[%c0_19, %c0_20] : memref<1x128xf32, #tpu.memory_space<vmem>>, vector<1x128xf32>
      tpu.vector_store %arg8[%c0_19, %c0_20], %28 {strides = array<i32>} : memref<1x128xf32, #tpu.memory_space<vmem>>, vector<1x128xf32>,
    } else {
    }
    %c1_i32 = arith.constant 1 : i32
    %11 = arith.cmpi eq, %arg0, %c1_i32 : i32
    %c0_i32_7 = arith.constant 0 : i32
    %12 = arith.cmpi eq, %arg1, %c0_i32_7 : i32
    %13 = arith.andi %11, %12 : i1
    %14 = arith.extui %13 : i1 to i32
    %c0_i32_8 = arith.constant 0 : i32
    %15 = arith.cmpi ne, %14, %c0_i32_8 : i32
    scf.if %15 {
      %c0_11 = arith.constant 0 : index
      %c0_12 = arith.constant 0 : index
      %19 = vector.load %arg7[%c0_11, %c0_12] : memref<1x128xf32, #tpu.memory_space<vmem>>, vector<1x128xf32>
      %cst_13 = arith.constant 0.00255102036 : f32
      %20 = vector.broadcast %cst_13 : f32 to vector<1x128xf32>
      %21 = arith.mulf %19, %20 : vector<1x128xf32>
      %c0_14 = arith.constant 0 : index
      %c0_15 = arith.constant 0 : index
      %22 = vector.load %arg8[%c0_14, %c0_15] : memref<1x128xf32, #tpu.memory_space<vmem>>, vector<1x128xf32>
      %cst_16 = arith.constant 0.00255102036 : f32
      %23 = vector.broadcast %cst_16 : f32 to vector<1x128xf32>
      %24 = arith.mulf %22, %23 : vector<1x128xf32>
      %25 = arith.mulf %21, %21 : vector<1x128xf32>
      %26 = arith.subf %24, %25 : vector<1x128xf32>
      %cst_17 = arith.constant 0.000000e+00 : f32
      %27 = vector.broadcast %cst_17 : f32 to vector<1x128xf32>
      %28 = arith.maximumf %26, %27 : vector<1x128xf32>
      %c0_18 = arith.constant 0 : index
      %c0_19 = arith.constant 0 : index
      %29 = vector.load %arg4[%c0_18, %c0_19] : memref<1x128xf32, #tpu.memory_space<vmem>>, vector<1x128xf32>
      %cst_20 = arith.constant 9.99999974E-6 : f32
      %30 = vector.broadcast %cst_20 : f32 to vector<1x128xf32>
      %31 = arith.addf %28, %30 : vector<1x128xf32>
      %32 = math.rsqrt %31 : vector<1x128xf32>
      %33 = arith.mulf %29, %32 : vector<1x128xf32>
      %c0_21 = arith.constant 0 : index
      %c0_22 = arith.constant 0 : index
      %34 = vector.load %arg9[%c0_21, %c0_22] : memref<1x128xf32, #tpu.memory_space<vmem>>, vector<1x128xf32>
      tpu.vector_store %arg9[%c0_21, %c0_22], %33 {strides = array<i32>} : memref<1x128xf32, #tpu.memory_space<vmem>>, vector<1x128xf32>,
      %c0_23 = arith.constant 0 : index
      %c0_24 = arith.constant 0 : index
      %35 = vector.load %arg5[%c0_23, %c0_24] : memref<1x128xf32, #tpu.memory_space<vmem>>, vector<1x128xf32>
      %36 = arith.mulf %21, %33 : vector<1x128xf32>
      %37 = arith.subf %35, %36 : vector<1x128xf32>
      %c0_25 = arith.constant 0 : index
      %c0_26 = arith.constant 0 : index
      %38 = vector.load %arg10[%c0_25, %c0_26] : memref<1x128xf32, #tpu.memory_space<vmem>>, vector<1x128xf32>
      tpu.vector_store %arg10[%c0_25, %c0_26], %37 {strides = array<i32>} : memref<1x128xf32, #tpu.memory_space<vmem>>, vector<1x128xf32>,
    } else {
    }
    %c1_i32_9 = arith.constant 1 : i32
    %16 = arith.cmpi eq, %arg0, %c1_i32_9 : i32
    %17 = arith.extui %16 : i1 to i32
    %c0_i32_10 = arith.constant 0 : i32
    %18 = arith.cmpi ne, %17, %c0_i32_10 : i32
    scf.if %18 {
      %c0_11 = arith.constant 0 : index
      %c0_12 = arith.constant 0 : index
      %19 = vector.load %arg9[%c0_11, %c0_12] : memref<1x128xf32, #tpu.memory_space<vmem>>, vector<1x128xf32>
      %20 = vector.broadcast %19 : vector<1x128xf32> to vector<392x128xf32>
      %21 = arith.mulf %2, %20 : vector<392x128xf32>
      %c0_13 = arith.constant 0 : index
      %c0_14 = arith.constant 0 : index
      %22 = vector.load %arg10[%c0_13, %c0_14] : memref<1x128xf32, #tpu.memory_space<vmem>>, vector<1x128xf32>
      %23 = vector.broadcast %22 : vector<1x128xf32> to vector<392x128xf32>
      %24 = arith.addf %21, %23 : vector<392x128xf32>
      %cst_15 = arith.constant 0.000000e+00 : f32
      %25 = vector.broadcast %cst_15 : f32 to vector<392x128xf32>
      %26 = arith.maximumf %24, %25 : vector<392x128xf32>
      %c0_16 = arith.constant 0 : index
      %c0_17 = arith.constant 0 : index
      %27 = vector.load %arg6[%c0_16, %c0_17] : memref<392x128xf32, #tpu.memory_space<vmem>>, vector<392x128xf32>
      tpu.vector_store %arg6[%c0_16, %c0_17], %26 {strides = array<i32>} : memref<392x128xf32, #tpu.memory_space<vmem>>, vector<392x128xf32>,
    } else {
    }
    return
  }
  func.func @transform_0(%arg0: i32, %arg1: i32) -> (i32, i32) {
    %c0_i32 = arith.constant 0 : i32
    %c0_i32_0 = arith.constant 0 : i32
    return %arg1, %c0_i32 : i32, i32
  }
  func.func @transform_1(%arg0: i32, %arg1: i32) -> (i32, i32) {
    %c0_i32 = arith.constant 0 : i32
    %c0_i32_0 = arith.constant 0 : i32
    %c0_i32_1 = arith.constant 0 : i32
    return %c0_i32, %c0_i32_0 : i32, i32
  }
  func.func @transform_2(%arg0: i32, %arg1: i32) -> (i32, i32) {
    %c0_i32 = arith.constant 0 : i32
    %c0_i32_0 = arith.constant 0 : i32
    %c0_i32_1 = arith.constant 0 : i32
    return %c0_i32, %c0_i32_0 : i32, i32
  }
  func.func @transform_3(%arg0: i32, %arg1: i32) -> (i32, i32) {
    %c0_i32 = arith.constant 0 : i32
    %c0_i32_0 = arith.constant 0 : i32
    %c0_i32_1 = arith.constant 0 : i32
    return %c0_i32, %c0_i32_0 : i32, i32
  }
  func.func @transform_4(%arg0: i32, %arg1: i32) -> (i32, i32) {
    %0 = arith.muli %arg1, %arg0 : i32
    %c0_i32 = arith.constant 0 : i32
    %c0_i32_0 = arith.constant 0 : i32
    return %0, %c0_i32 : i32, i32
  }
}

</mosaic_0001>

<bundles_post_ra>
// kernel: conv_norm_relu.1
= control target key start
LH: loop header
LB: loop body
LE: loop exit
PB: predicated region body
PF: predicated region fallthrough
CT: control target
= control target key end

     0   :  { %s1521_s15 = smov 0   ;;  %s1523_s16 = smov 0   ;;  %s2270_s0 = inlined_call_operand.vmem [shape: bf16[392,36], index: 0, kind: input, shape index: {}]   ;;  %s2271_s1 = inlined_call_operand.vmem [shape: bf16[36,128], index: 1, kind: input, shape index: {}]   ;;  %s2272_s2 = inlined_call_operand.vmem [shape: f32[1,128], index: 2, kind: input, shape index: {}]   ;;  %s2273_s3 = inlined_call_operand.vmem [shape: f32[1,128], index: 3, kind: input, shape index: {}]   ;;  %s2274_s4 = inlined_call_operand.vmem [shape: f32[392,128], index: 4, kind: output, shape index: {}]  }
   0x1   :  { %s1525_s17 = smov 0  }
   0x2 LB: > { %s26_s18 = sadd.s32 1, %s1487_s16  ;;  %p1206_p0 = scmp.ge.s32.totalorder %s1491_s17, 1  ;;  %s1491_s17 = sphi %s1525_s17, %s14_s17   ;;  %s1487_s16 = sphi %s1523_s16, %s2297_s16   ;;  %s1483_s15 = sphi %s1521_s15, %s2296_s15  }
   0x3   : > { %p28_p1 = scmp.ge.s32.totalorder %s26_s18, 2  ;;  %p177_p2 = scmp.lt.s32.totalorder %s1491_s17, 3 }
   0x5   : > { %s2299_s18 = smov (%p28_p1, %s26_s18), 0  ;;  %p178_p3 = pnand %p1206_p0, %p177_p2 }
   0x7   : > { %181 = sbr.rel (%p178_p3) target bundleno = 541 (0x21d), region = 36 }
   0xe   : > { %v1439_v0 = vld [vmem:[%s2271_s1] sm:$0xff]   ;;  %v1493_v1 = vmov 0.0   ;;  %v1440_v2 = vld [vmem:[%s2271_s1 + $0x8] sm:$0xff]   ;;  %v1441_v3 = vld [vmem:[%s2271_s1 + $0x10] ss:$0 sps:$4 sm:$0x33]  }
   0xf   : > { %1300 = vmatprep.subr.bf16.mxu0 %v1493_v1  ;;  %1406 = vmatprep.subr.bf16.mxu1 %v1493_v1  ;;  %vm487_vm0 = vcmask 1041408   ;;  %vm1494_vm1 = vmmov 0   ;;  %v1442_v5 = vld [vmem:[%s2270_s0] sm:$0xff]   ;;  %v1443_v6 = vld [vmem:[%s2270_s0 + $0x68] sm:$0xff]   ;;  %vm411_vm2 = vcmask 293888   ;;  %v1445_v8 = vld [vmem:[%s2270_s0 + $0x70] sm:$0xff]  }
  0x10   : > { %1301 = vmatpush3.bf16.msra.mxu0 %v1439_v0  ;;  %1409 = vmatpush3.bf16.msra.mxu1 %v1439_v0  ;;  %v489_v4 = vsel %vm487_vm0, %v1441_v3, 0  ;;  %v1444_v7 = vld [vmem:[%s2270_s0 + $0x8] sm:$0xff]   ;;  %v1446_v9 = vld [vmem:[%s2270_s0 + $0x10] sm:$0xff]   ;;  %v1447_v10 = vld [vmem:[%s2270_s0 + $0x78] sm:$0xff]   ;;  %p723_p4 = scmp.eq.s32.totalorder %s1483_s15, 0 }
  0x11   : > { %1302 = vmatprep.subr.bf16.mxu0 %v1493_v1  ;;  %1407 = vmatprep.subr.bf16.mxu1 %v1493_v1  ;;  %v1448_v11 = vld [vmem:[%s2270_s0 + $0x18] sm:$0xff]   ;;  %v1449_v12 = vld [vmem:[%s2270_s0 + $0x80] sm:$0xff]   ;;  %v1451_v14 = vld [vmem:[%s2270_s0 + $0x88] sm:$0xff]  }
  0x12   : > { %1306 = vmatprep.mubr.msk.bf16.mxu0 %vm1494_vm1, %v1493_v1  ;;  %1358 = vmatprep.mubr.msk.bf16.mxu1 %vm1494_vm1, %v1493_v1  ;;  %v1450_v13 = vld [vmem:[%s2270_s0 + $0x20] sm:$0xff]   ;;  %v1452_v15 = vld [vmem:[%s2270_s0 + $0x28] sm:$0xff]   ;;  %v1453_v16 = vld [vmem:[%s2270_s0 + $0x90] sm:$0xff]  }
  0x13   : > { %v1454_v17 = vld [vmem:[%s2270_s0 + $0x30] sm:$0xff]   ;;  %v1455_v18 = vld [vmem:[%s2270_s0 + $0x98] sm:$0xff]   ;;  %v1457_v20 = vld [vmem:[%s2270_s0 + $0xa0] sm:$0xff]  }
  0x14   : > { %1303 = vmatpush3.bf16.msra.mxu0 %v1440_v2  ;;  %1410 = vmatpush3.bf16.msra.mxu1 %v1440_v2  ;;  %v1456_v19 = vld [vmem:[%s2270_s0 + $0x38] sm:$0xff]   ;;  %v1458_v21 = vld [vmem:[%s2270_s0 + $0x40] sm:$0xff]   ;;  %v1459_v22 = vld [vmem:[%s2270_s0 + $0xa8] sm:$0xff]  }
  0x15   : > { %1304 = vmatprep.subr.bf16.mxu0 %v1493_v1  ;;  %1408 = vmatprep.subr.bf16.mxu1 %v1493_v1  ;;  %v1460_v23 = vld [vmem:[%s2270_s0 + $0x48] sm:$0xff]   ;;  %v1461_v24 = vld [vmem:[%s2270_s0 + $0xb0] sm:$0xff]   ;;  %v1463_v26 = vld [vmem:[%s2270_s0 + $0xb8] sm:$0xff]  }
  0x16   : > { %v1462_v25 = vld [vmem:[%s2270_s0 + $0x50] sm:$0xff]   ;;  %v1464_v27 = vld [vmem:[%s2270_s0 + $0x58] sm:$0xff]   ;;  %v1465_v28 = vld [vmem:[%s2270_s0 + $0xc0] ss:$0 sps:$4 sm:$0xff]  }
  0x17   : > { %v1466_v29 = vld [vmem:[%s2270_s0 + $0x60] sm:$0xff]  }
  0x18   : > { %1305 = vmatpush3.bf16.msra.mxu0 %v489_v4  ;;  %1411 = vmatpush3.bf16.msra.mxu1 %v489_v4 }
  0x1b   : > { %1307 = vmatmul.mubr.msk.bf16.vlgmr.msra.gmra.mrb[0].mxu0 %vm411_vm2, %v1442_v5  ;;  %1359 = vmatmul.mubr.msk.bf16.vlgmr.msra.gmra.mrb[0].mxu1 %vm411_vm2, %v1443_v6 }
  0x1c   : > { %1310 = vmatprep.mubr.msk.bf16.mxu0 %vm1494_vm1, %v1493_v1  ;;  %1362 = vmatprep.mubr.msk.bf16.mxu1 %vm1494_vm1, %v1493_v1 }
  0x23   : > { %1311 = vmatmul.mubr.msk.bf16.gmra.mrb[4].mxu0 %vm411_vm2, %v1444_v7  ;;  %1363 = vmatmul.mubr.msk.bf16.gmra.mrb[4].mxu1 %vm411_vm2, %v1445_v8 }
  0x24   : > { %1314 = vmatprep.mubr.msk.bf16.mxu0 %vm1494_vm1, %v1493_v1  ;;  %1366 = vmatprep.mubr.msk.bf16.mxu1 %vm1494_vm1, %v1493_v1 }
  0x2b   : > { %1315 = vmatmul.mubr.msk.bf16.gmra.mrb[8].mxu0 %vm411_vm2, %v1446_v9  ;;  %1367 = vmatmul.mubr.msk.bf16.gmra.mrb[8].mxu1 %vm411_vm2, %v1447_v10 }
  0x2c   : > { %1318 = vmatprep.mubr.msk.bf16.mxu0 %vm1494_vm1, %v1493_v1  ;;  %1370 = vmatprep.mubr.msk.bf16.mxu1 %vm1494_vm1, %v1493_v1 }
  0x33   : > { %1319 = vmatmul.mubr.msk.bf16.gmra.mrb[12].mxu0 %vm411_vm2, %v1448_v11  ;;  %1371 = vmatmul.mubr.msk.bf16.gmra.mrb[12].mxu1 %vm411_vm2, %v1449_v12 }
  0x34   : > { %1322 = vmatprep.mubr.msk.bf16.mxu0 %vm1494_vm1, %v1493_v1  ;;  %1374 = vmatprep.mubr.msk.bf16.mxu1 %vm1494_vm1, %v1493_v1 }
  0x3b   : > { %1323 = vmatmul.mubr.msk.bf16.gmra.mrb[16].mxu0 %vm411_vm2, %v1450_v13  ;;  %1375 = vmatmul.mubr.msk.bf16.gmra.mrb[16].mxu1 %vm411_vm2, %v1451_v14 }
  0x3c   : > { %1326 = vmatprep.mubr.msk.bf16.mxu0 %vm1494_vm1, %v1493_v1  ;;  %1378 = vmatprep.mubr.msk.bf16.mxu1 %vm1494_vm1, %v1493_v1 }
  0x43   : > { %1327 = vmatmul.mubr.msk.bf16.gmra.mrb[20].mxu0 %vm411_vm2, %v1452_v15  ;;  %1379 = vmatmul.mubr.msk.bf16.gmra.mrb[20].mxu1 %vm411_vm2, %v1453_v16 }
  0x44   : > { %1330 = vmatprep.mubr.msk.bf16.mxu0 %vm1494_vm1, %v1493_v1  ;;  %1382 = vmatprep.mubr.msk.bf16.mxu1 %vm1494_vm1, %v1493_v1 }
  0x4b   : > { %1331 = vmatmul.mubr.msk.bf16.gmra.mrb[24].mxu0 %vm411_vm2, %v1454_v17  ;;  %1383 = vmatmul.mubr.msk.bf16.gmra.mrb[24].mxu1 %vm411_vm2, %v1455_v18 }
  0x4c   : > { %1334 = vmatprep.mubr.msk.bf16.mxu0 %vm1494_vm1, %v1493_v1  ;;  %1386 = vmatprep.mubr.msk.bf16.mxu1 %vm1494_vm1, %v1493_v1 }
  0x53   : > { %1335 = vmatmul.mubr.msk.bf16.gmra.mrb[28].mxu0 %vm411_vm2, %v1456_v19  ;;  %1387 = vmatmul.mubr.msk.bf16.gmra.mrb[28].mxu1 %vm411_vm2, %v1457_v20 }
  0x54   : > { %1338 = vmatprep.mubr.msk.bf16.mxu0 %vm1494_vm1, %v1493_v1  ;;  %1390 = vmatprep.mubr.msk.bf16.mxu1 %vm1494_vm1, %v1493_v1 }
  0x5b   : > { %1339 = vmatmul.mubr.msk.bf16.gmra.mrb[32].mxu0 %vm411_vm2, %v1458_v21  ;;  %1391 = vmatmul.mubr.msk.bf16.gmra.mrb[32].mxu1 %vm411_vm2, %v1459_v22 }
  0x5c   : > { %1342 = vmatprep.mubr.msk.bf16.mxu0 %vm1494_vm1, %v1493_v1  ;;  %1394 = vmatprep.mubr.msk.bf16.mxu1 %vm1494_vm1, %v1493_v1 }
  0x63   : > { %1343 = vmatmul.mubr.msk.bf16.gmra.mrb[36].mxu0 %vm411_vm2, %v1460_v23  ;;  %1395 = vmatmul.mubr.msk.bf16.gmra.mrb[36].mxu1 %vm411_vm2, %v1461_v24 }
  0x64   : > { %1346 = vmatprep.mubr.msk.bf16.mxu0 %vm1494_vm1, %v1493_v1  ;;  %1398 = vmatprep.mubr.msk.bf16.mxu1 %vm1494_vm1, %v1493_v1 }
  0x6b   : > { %1347 = vmatmul.mubr.msk.bf16.gmra.mrb[40].mxu0 %vm411_vm2, %v1462_v25  ;;  %1399 = vmatmul.mubr.msk.bf16.gmra.mrb[40].mxu1 %vm411_vm2, %v1463_v26 }
  0x6c   : > { %1350 = vmatprep.mubr.msk.bf16.mxu0 %vm1494_vm1, %v1493_v1  ;;  %1402 = vmatprep.mubr.msk.bf16.mxu1 %vm1494_vm1, %v1493_v1 }
  0x73   : > { %1351 = vmatmul.mubr.msk.bf16.gmra.mrb[44].mxu0 %vm411_vm2, %v1464_v27  ;;  %1403 = vmatmul.mubr.msk.bf16.gmra.mrb[44].mxu1 %vm411_vm2, %v1465_v28 }
  0x74   : > { %1354 = vmatprep.mubr.msk.bf16.mxu0 %vm1494_vm1, %v1493_v1 }
  0x7b   : > { %1355 = vmatmul.mubr.msk.bf16.gmra.mrb[48].mxu0 %vm411_vm2, %v1466_v29 }
  0xee   : > { %v1707_v30 = vpop.f32.mrb[0].mxu0  ;;  %v1709_v31 = vpop.f32.mrb[0].mxu1 }
  0xef   : > { %v1308_v32 = vpop.f32.mrb[1].mxu0  ;;  %v1360_v33 = vpop.f32.mrb[1].mxu1 }
  0xf0   : > { %v1711_v34 = vpop.f32.mrb[2].mxu0  ;;  %v1713_v35 = vpop.f32.mrb[2].mxu1 }
  0xf1   : > { %v1309_v36 = vpop.f32.mrb[3].mxu0  ;;  %v1361_v37 = vpop.f32.mrb[3].mxu1 }
  0xf6   : > { %v1715_v38 = vpop.f32.mrb[4].mxu0  ;;  %v1717_v39 = vpop.f32.mrb[4].mxu1 }
  0xf7   : > { %v1312_v40 = vpop.f32.mrb[5].mxu0  ;;  %v1364_v41 = vpop.f32.mrb[5].mxu1 }
  0xf8   : > { %v1719_v42 = vpop.f32.mrb[6].mxu0  ;;  %v1721_v43 = vpop.f32.mrb[6].mxu1 }
  0xf9   : > { %v1313_v44 = vpop.f32.mrb[7].mxu0  ;;  %v1365_v45 = vpop.f32.mrb[7].mxu1 }
  0xfe   : > { %v1723_v46 = vpop.f32.mrb[8].mxu0  ;;  %v1725_v47 = vpop.f32.mrb[8].mxu1 }
  0xff   : > { %v1316_v48 = vpop.f32.mrb[9].mxu0  ;;  %v1368_v49 = vpop.f32.mrb[9].mxu1 }
 0x100   : > { %v1727_v50 = vpop.f32.mrb[10].mxu0  ;;  %v1729_v51 = vpop.f32.mrb[10].mxu1 }
 0x101   : > { %v1317_v52 = vpop.f32.mrb[11].mxu0  ;;  %v1369_v53 = vpop.f32.mrb[11].mxu1 }
 0x106   : > { %v1731_v54 = vpop.f32.mrb[12].mxu0  ;;  %v1733_v55 = vpop.f32.mrb[12].mxu1 }
 0x107   : > { %v1320_v56 = vpop.f32.mrb[13].mxu0  ;;  %v1372_v57 = vpop.f32.mrb[13].mxu1 }
 0x108   : > { %v1735_v58 = vpop.f32.mrb[14].mxu0  ;;  %v1737_v59 = vpop.f32.mrb[14].mxu1 }
 0x109   : > { %v1321_v60 = vpop.f32.mrb[15].mxu0  ;;  %v1373_v61 = vpop.f32.mrb[15].mxu1 }
 0x10e   : > { %v1739_v62 = vpop.f32.mrb[16].mxu0  ;;  %v1741_v63 = vpop.f32.mrb[16].mxu1 }
 0x10f   : > { %v1324_v0 = vpop.f32.mrb[17].mxu0  ;;  %v1376_v1 = vpop.f32.mrb[17].mxu1 }
 0x110   : > { %v1743_v2 = vpop.f32.mrb[18].mxu0  ;;  %v1745_v3 = vpop.f32.mrb[18].mxu1 }
 0x111   : > { %v1325_v4 = vpop.f32.mrb[19].mxu0  ;;  %v1377_v5 = vpop.f32.mrb[19].mxu1 }
 0x116   : > { %v1747_v6 = vpop.f32.mrb[20].mxu0  ;;  %v1749_v7 = vpop.f32.mrb[20].mxu1 }
 0x117   : > { %v1328_v8 = vpop.f32.mrb[21].mxu0  ;;  %v1380_v9 = vpop.f32.mrb[21].mxu1 }
 0x118   : > { %v1751_v10 = vpop.f32.mrb[22].mxu0  ;;  %v1753_v11 = vpop.f32.mrb[22].mxu1 }
 0x119   : > { %v1329_v12 = vpop.f32.mrb[23].mxu0  ;;  %v1381_v13 = vpop.f32.mrb[23].mxu1 }
 0x11e   : > { %v1755_v14 = vpop.f32.mrb[24].mxu0  ;;  %v1757_v15 = vpop.f32.mrb[24].mxu1 }
 0x11f   : > { %v1332_v16 = vpop.f32.mrb[25].mxu0  ;;  %v1384_v17 = vpop.f32.mrb[25].mxu1 }
 0x120   : > { %v1759_v18 = vpop.f32.mrb[26].mxu0  ;;  %v1761_v19 = vpop.f32.mrb[26].mxu1 }
 0x121   : > { %v1333_v20 = vpop.f32.mrb[27].mxu0  ;;  %v1385_v21 = vpop.f32.mrb[27].mxu1 }
 0x126   : > { %v1763_v22 = vpop.f32.mrb[28].mxu0  ;;  %v1765_v23 = vpop.f32.mrb[28].mxu1 }
 0x127   : > { %2282 = vst [vmem:[#allocation6_spill] sm:$0xff] %v1765_v23  ;;  %v1336_v24 = vpop.f32.mrb[29].mxu0  ;;  %v1388_v25 = vpop.f32.mrb[29].mxu1 }
 0x128   : > { %v1767_v26 = vpop.f32.mrb[30].mxu0  ;;  %v1769_v27 = vpop.f32.mrb[30].mxu1 }
 0x129   : > { %v1337_v28 = vpop.f32.mrb[31].mxu0  ;;  %v1389_v29 = vpop.f32.mrb[31].mxu1 }
 0x12e   : > { %v1771_v32 = vpop.f32.mrb[32].mxu0  ;;  %v1773_v33 = vpop.f32.mrb[32].mxu1 }
 0x12f   : > { %2283 = vst [vmem:[#allocation7_spill] sm:$0xff] %v1773_v33  ;;  %v1340_v36 = vpop.f32.mrb[33].mxu0  ;;  %v1392_v37 = vpop.f32.mrb[33].mxu1 }
 0x130   : > { %v1775_v40 = vpop.f32.mrb[34].mxu0  ;;  %v1777_v41 = vpop.f32.mrb[34].mxu1 }
 0x131   : > { %2284 = vst [vmem:[#allocation8_spill] sm:$0xff] %v1777_v41  ;;  %v1341_v44 = vpop.f32.mrb[35].mxu0  ;;  %v1393_v45 = vpop.f32.mrb[35].mxu1 }
 0x136   : > { %v1779_v48 = vpop.f32.mrb[36].mxu0  ;;  %v1781_v49 = vpop.f32.mrb[36].mxu1 }
 0x137   : > { %2285 = vst [vmem:[#allocation9_spill] sm:$0xff] %v1781_v49  ;;  %v1344_v52 = vpop.f32.mrb[37].mxu0  ;;  %v1396_v53 = vpop.f32.mrb[37].mxu1 }
 0x138   : > { %v1783_v56 = vpop.f32.mrb[38].mxu0  ;;  %v1785_v57 = vpop.f32.mrb[38].mxu1  ;;  %v1495_v52 = vmov (%p723_p4), 0.0  }
 0x139   : > { %2286 = vst [vmem:[#allocation10_spill] sm:$0xff] %v1785_v57  ;;  %v1345_v60 = vpop.f32.mrb[39].mxu0  ;;  %v1397_v61 = vpop.f32.mrb[39].mxu1  ;;  %729 = vst [vmem:[#allocation2] sm:$0x1] (%p723_p4), %v1495_v52 }
 0x13a   : > { %730 = vst [vmem:[#allocation3] sm:$0x1] (%p723_p4), %v1495_v52 }
 0x13e   : > { %v1787_v0 = vpop.f32.mrb[40].mxu0  ;;  %v1789_v1 = vpop.f32.mrb[40].mxu1 }
 0x13f   : > { %2287 = vst [vmem:[#allocation11_spill] sm:$0xff] %v1789_v1  ;;  %v1348_v4 = vpop.f32.mrb[41].mxu0  ;;  %v1400_v5 = vpop.f32.mrb[41].mxu1 }
 0x140   : > { %v1791_v8 = vpop.f32.mrb[42].mxu0  ;;  %v1793_v9 = vpop.f32.mrb[42].mxu1 }
 0x141   : > { %2288 = vst [vmem:[#allocation12_spill] sm:$0xff] %v1793_v9  ;;  %v1349_v12 = vpop.f32.mrb[43].mxu0  ;;  %v1401_v13 = vpop.f32.mrb[43].mxu1 }
 0x146   : > { %v1795_v16 = vpop.f32.mrb[44].mxu0  ;;  %v1797_v17 = vpop.f32.mrb[44].mxu1 }
 0x147   : > { %v1352_v20 = vpop.f32.mrb[45].mxu0  ;;  %v1404_v21 = vpop.f32.mrb[45].mxu1 }
 0x148   : > { %v1799_v24 = vpop.f32.mrb[46].mxu0  ;;  %v720_v25 = vpop.f32.mrb[46].mxu1 }
 0x149   : > { %v1353_v28 = vpop.f32.mrb[47].mxu0  ;;  %v1405_v29 = vpop.f32.mrb[47].mxu1 }
 0x14b   : > { %728 = sbr.rel (!%p723_p4) target bundleno = 338 (0x152), region = 40 }
 0x14e   : > { %v1801_v36 = vpop.f32.mrb[48].mxu0 }
 0x14f   : > { %v1356_v37 = vpop.f32.mrb[49].mxu0 }
 0x150   : > { %v1803_v44 = vpop.f32.mrb[50].mxu0 }
 0x151   : > { %v1357_v45 = vpop.f32.mrb[51].mxu0 }
 0x152 PF: > { %p1261_p5 = scmp.ne.s32.totalorder %s1483_s15, 0 }
 0x153   : > { %v735_v53 = vadd.f32 (!%p1261_p5), %v1711_v34, %v1707_v30  ;;  %v792_v13 = vmul.f32 (!%p1261_p5), %v1707_v30, %v1707_v30  ;;  %v793_v20 = vmul.f32 (!%p1261_p5), %v1711_v34, %v1711_v34  ;;  %v794_v25 = vmul.f32 (!%p1261_p5), %v1715_v38, %v1715_v38 }
 0x154   : > { %733 = sbr.rel (%p1261_p5) target bundleno = 458 (0x1ca), region = 44  ;;  %v795_v29 = vmul.f32 (!%p1261_p5), %v1719_v42, %v1719_v42  ;;  %v796_v52 = vmul.f32 (!%p1261_p5), %v1723_v46, %v1723_v46 }
 0x155   : > { %v736_v60 = vadd.f32 (!%p1261_p5), %v735_v53, %v1715_v38  ;;  %v841_v37 = vadd.f32 (!%p1261_p5), %v793_v20, %v792_v13  ;;  %v799_v20 = vmul.f32 (!%p1261_p5), %v1735_v58, %v1735_v58 }
 0x157   : > { %v737_v61 = vadd.f32 (!%p1261_p5), %v736_v60, %v1719_v42  ;;  %v842_v53 = vadd.f32 (!%p1261_p5), %v841_v37, %v794_v25  ;;  %v800_v37 = vmul.f32 (!%p1261_p5), %v1739_v62, %v1739_v62 }
 0x159   : > { %v738_v4 = vadd.f32 (!%p1261_p5), %v737_v61, %v1723_v46  ;;  %v797_v61 = vmul.f32 (!%p1261_p5), %v1727_v50, %v1727_v50 }
 0x15b   : > { %v739_v5 = vadd.f32 %v738_v4, %v1727_v50  ;;  %v843_v4 = vadd.f32 %v842_v53, %v795_v29  ;;  %v801_v53 = vmul.f32 %v1743_v2, %v1743_v2 }
 0x15d   : > { %v740_v12 = vadd.f32 %v739_v5, %v1731_v54 }
 0x15f   : > { %v741_v21 = vadd.f32 %v740_v12, %v1735_v58  ;;  %v798_v12 = vmul.f32 %v1731_v54, %v1731_v54 }
 0x161   : > { %v742_v28 = vadd.f32 %v741_v21, %v1739_v62  ;;  %v844_v21 = vadd.f32 %v843_v4, %v796_v52  ;;  %v802_v4 = vmul.f32 %v1747_v6, %v1747_v6 }
 0x163   : > { %v743_v45 = vadd.f32 %v742_v28, %v1743_v2  ;;  %v845_v28 = vadd.f32 %v844_v21, %v797_v61  ;;  %v803_v21 = vmul.f32 %v1751_v10, %v1751_v10 }
 0x165   : > { %v744_v60 = vadd.f32 %v743_v45, %v1747_v6  ;;  %v846_v45 = vadd.f32 %v845_v28, %v798_v12  ;;  %v804_v28 = vmul.f32 %v1755_v14, %v1755_v14 }
 0x167   : > { %v745_v5 = vadd.f32 %v744_v60, %v1751_v10  ;;  %v847_v60 = vadd.f32 %v846_v45, %v799_v20  ;;  %v805_v45 = vmul.f32 %v1759_v18, %v1759_v18 }
 0x169   : > { %v746_v13 = vadd.f32 %v745_v5, %v1755_v14  ;;  %v848_v5 = vadd.f32 %v847_v60, %v800_v37  ;;  %v806_v60 = vmul.f32 %v1763_v22, %v1763_v22 }
 0x16b   : > { %v747_v25 = vadd.f32 %v746_v13, %v1759_v18  ;;  %v849_v13 = vadd.f32 %v848_v5, %v801_v53  ;;  %v807_v5 = vmul.f32 %v1767_v26, %v1767_v26 }
 0x16d   : > { %v748_v29 = vadd.f32 %v747_v25, %v1763_v22  ;;  %v850_v25 = vadd.f32 %v849_v13, %v802_v4  ;;  %v808_v13 = vmul.f32 %v1771_v32, %v1771_v32 }
 0x16f   : > { %v749_v52 = vadd.f32 %v748_v29, %v1767_v26  ;;  %v851_v29 = vadd.f32 %v850_v25, %v803_v21  ;;  %v809_v25 = vmul.f32 %v1775_v40, %v1775_v40 }
 0x171   : > { %v750_v61 = vadd.f32 %v749_v52, %v1771_v32  ;;  %v852_v52 = vadd.f32 %v851_v29, %v804_v28  ;;  %v810_v29 = vmul.f32 %v1779_v48, %v1779_v48 }
 0x173   : > { %v751_v12 = vadd.f32 %v750_v61, %v1775_v40  ;;  %v853_v61 = vadd.f32 %v852_v52, %v805_v45  ;;  %v811_v52 = vmul.f32 %v1783_v56, %v1783_v56 }
 0x175   : > { %v752_v20 = vadd.f32 %v751_v12, %v1779_v48  ;;  %v854_v12 = vadd.f32 %v853_v61, %v806_v60  ;;  %v812_v61 = vmul.f32 %v1787_v0, %v1787_v0 }
 0x177   : > { %v753_v37 = vadd.f32 %v752_v20, %v1783_v56  ;;  %v855_v20 = vadd.f32 %v854_v12, %v807_v5  ;;  %v813_v12 = vmul.f32 %v1791_v8, %v1791_v8 }
 0x179   : > { %v754_v53 = vadd.f32 %v753_v37, %v1787_v0  ;;  %v856_v37 = vadd.f32 %v855_v20, %v808_v13  ;;  %v814_v20 = vmul.f32 %v1795_v16, %v1795_v16 }
 0x17b   : > { %v755_v4 = vadd.f32 %v754_v53, %v1791_v8  ;;  %v857_v53 = vadd.f32 %v856_v37, %v809_v25  ;;  %v815_v37 = vmul.f32 %v1799_v24, %v1799_v24 }
 0x17d   : > { %v756_v21 = vadd.f32 %v755_v4, %v1795_v16  ;;  %v858_v4 = vadd.f32 %v857_v53, %v810_v29  ;;  %v816_v53 = vmul.f32 %v1801_v36, %v1801_v36 }
 0x17f   : > { %v757_v28 = vadd.f32 %v756_v21, %v1799_v24  ;;  %v859_v21 = vadd.f32 %v858_v4, %v811_v52  ;;  %v817_v4 = vmul.f32 %v1803_v44, %v1803_v44 }
 0x181   : > { %v758_v45 = vadd.f32 %v757_v28, %v1801_v36  ;;  %v860_v28 = vadd.f32 %v859_v21, %v812_v61  ;;  %v818_v21 = vmul.f32 %v1709_v31, %v1709_v31 }
 0x183   : > { %v759_v60 = vadd.f32 %v758_v45, %v1803_v44  ;;  %v861_v45 = vadd.f32 %v860_v28, %v813_v12  ;;  %v819_v28 = vmul.f32 %v1713_v35, %v1713_v35 }
 0x185   : > { %v760_v5 = vadd.f32 %v759_v60, %v1709_v31  ;;  %v862_v60 = vadd.f32 %v861_v45, %v814_v20  ;;  %v820_v45 = vmul.f32 %v1717_v39, %v1717_v39 }
 0x187   : > { %v761_v13 = vadd.f32 %v760_v5, %v1713_v35  ;;  %v863_v5 = vadd.f32 %v862_v60, %v815_v37  ;;  %v821_v60 = vmul.f32 %v1721_v43, %v1721_v43 }
 0x189   : > { %v762_v25 = vadd.f32 %v761_v13, %v1717_v39  ;;  %v864_v13 = vadd.f32 %v863_v5, %v816_v53  ;;  %v822_v5 = vmul.f32 %v1725_v47, %v1725_v47 }
 0x18b   : > { %v763_v29 = vadd.f32 %v762_v25, %v1721_v43  ;;  %v865_v25 = vadd.f32 %v864_v13, %v817_v4  ;;  %v823_v13 = vmul.f32 %v1729_v51, %v1729_v51 }
 0x18d   : > { %v764_v52 = vadd.f32 %v763_v29, %v1725_v47  ;;  %v866_v29 = vadd.f32 %v865_v25, %v818_v21  ;;  %v824_v25 = vmul.f32 %v1733_v55, %v1733_v55 }
 0x18f   : > { %v765_v61 = vadd.f32 %v764_v52, %v1729_v51  ;;  %v867_v52 = vadd.f32 %v866_v29, %v819_v28  ;;  %v825_v29 = vmul.f32 %v1737_v59, %v1737_v59 }
 0x191   : > { %v766_v12 = vadd.f32 %v765_v61, %v1733_v55  ;;  %v868_v61 = vadd.f32 %v867_v52, %v820_v45  ;;  %v826_v52 = vmul.f32 %v1741_v63, %v1741_v63 }
 0x193   : > { %v767_v20 = vadd.f32 %v766_v12, %v1737_v59  ;;  %v869_v12 = vadd.f32 %v868_v61, %v821_v60  ;;  %v827_v61 = vmul.f32 %v1745_v3, %v1745_v3 }
 0x195   : > { %v768_v37 = vadd.f32 %v767_v20, %v1741_v63  ;;  %v870_v20 = vadd.f32 %v869_v12, %v822_v5  ;;  %v828_v12 = vmul.f32 %v1749_v7, %v1749_v7 }
 0x197   : > { %v769_v53 = vadd.f32 %v768_v37, %v1745_v3  ;;  %v871_v37 = vadd.f32 %v870_v20, %v823_v13  ;;  %v829_v20 = vmul.f32 %v1753_v11, %v1753_v11 }
 0x199   : > { %v770_v4 = vadd.f32 %v769_v53, %v1749_v7  ;;  %v872_v53 = vadd.f32 %v871_v37, %v824_v25  ;;  %v830_v37 = vmul.f32 %v1757_v15, %v1757_v15 }
 0x19b   : > { %v771_v21 = vadd.f32 %v770_v4, %v1753_v11  ;;  %v873_v4 = vadd.f32 %v872_v53, %v825_v29  ;;  %v831_v53 = vmul.f32 %v1761_v19, %v1761_v19 }
 0x19d   : > { %v772_v28 = vadd.f32 %v771_v21, %v1757_v15  ;;  %v874_v21 = vadd.f32 %v873_v4, %v826_v52  ;;  %v832_v4 = vmul.f32 %v1765_v23, %v1765_v23 }
 0x19f   : > { %v773_v45 = vadd.f32 %v772_v28, %v1761_v19  ;;  %v875_v28 = vadd.f32 %v874_v21, %v827_v61  ;;  %v833_v21 = vmul.f32 %v1769_v27, %v1769_v27 }
 0x1a1   : > { %v774_v60 = vadd.f32 %v773_v45, %v1765_v23  ;;  %v876_v45 = vadd.f32 %v875_v28, %v828_v12  ;;  %v834_v28 = vmul.f32 %v1773_v33, %v1773_v33 }
 0x1a3   : > { %v775_v5 = vadd.f32 %v774_v60, %v1769_v27  ;;  %v877_v60 = vadd.f32 %v876_v45, %v829_v20  ;;  %v835_v45 = vmul.f32 %v1777_v41, %v1777_v41 }
 0x1a5   : > { %v776_v13 = vadd.f32 %v775_v5, %v1773_v33  ;;  %v878_v5 = vadd.f32 %v877_v60, %v830_v37  ;;  %v836_v37 = vmul.f32 %v1781_v49, %v1781_v49 }
 0x1a7   : > { %v777_v25 = vadd.f32 %v776_v13, %v1777_v41  ;;  %v879_v13 = vadd.f32 %v878_v5, %v831_v53  ;;  %v837_v53 = vmul.f32 %v1785_v57, %v1785_v57  ;;  %v839_v41 = vmul.f32 %v1793_v9, %v1793_v9 }
 0x1a9   : > { %v778_v29 = vadd.f32 %v777_v25, %v1781_v49  ;;  %v880_v25 = vadd.f32 %v879_v13, %v832_v4  ;;  %v838_v4 = vmul.f32 %v1789_v1, %v1789_v1  ;;  %v840_v49 = vmul.f32 %v1797_v17, %v1797_v17 }
 0x1ab   : > { %v779_v52 = vadd.f32 %v778_v29, %v1785_v57  ;;  %v881_v29 = vadd.f32 %v880_v25, %v833_v21 }
 0x1ad   : > { %v780_v61 = vadd.f32 %v779_v52, %v1789_v1  ;;  %v882_v60 = vadd.f32 %v881_v29, %v834_v28 }
 0x1af   : > { %v781_v12 = vadd.f32 %v780_v61, %v1793_v9  ;;  %v883_v5 = vadd.f32 %v882_v60, %v835_v45 }
 0x1b1   : > { %v782_v20 = vadd.f32 %v781_v12, %v1797_v17  ;;  %v884_v13 = vadd.f32 %v883_v5, %v836_v37  ;;  %v791_v5 = vld [vmem:[#allocation3] sm:$0x1] }
 0x1b3   : > { %v783_v23 = vrot.slane %v782_v20, 4  ;;  %v885_v21 = vadd.f32 %v884_v13, %v837_v53 }
 0x1b5   : > { %v784_v52 = vadd.f32 %v783_v23, %v782_v20  ;;  %v886_v28 = vadd.f32 %v885_v21, %v838_v4  ;;  %v734_v23 = vld [vmem:[#allocation2] sm:$0x1] }
 0x1b7   : > { %v785_v61 = vrot.slane %v784_v52, 2  ;;  %v887_v29 = vadd.f32 %v886_v28, %v839_v41 }
 0x1b9   : > { %v786_v12 = vadd.f32 %v785_v61, %v784_v52  ;;  %v888_v45 = vadd.f32 %v887_v29, %v840_v49 }
 0x1bb   : > { %v787_v25 = vrot.slane %v786_v12, 1  ;;  %v889_v60 = vrot.slane %v888_v45, 4 }
 0x1bd   : > { %v788_v20 = vadd.f32 %v787_v25, %v786_v12  ;;  %v890_v33 = vadd.f32 %v889_v60, %v888_v45 }
 0x1bf   : > { %v789_v57 = vadd.f32 %v788_v20, %v734_v23  ;;  %v891_v1 = vrot.slane %v890_v33, 2 }
 0x1c1   : > { %790 = vst [vmem:[#allocation2] sm:$0x1] %v789_v57  ;;  %v892_v37 = vadd.f32 %v891_v1, %v890_v33 }
 0x1c3   : > { %v893_v52 = vrot.slane %v892_v37, 1 }
 0x1c5   : > { %v894_v61 = vadd.f32 %v893_v52, %v892_v37 }
 0x1c7   : > { %v895_v9 = vadd.f32 %v894_v61, %v791_v5 }
 0x1c9   : > { %896 = vst [vmem:[#allocation3] sm:$0x1] %v895_v9 }
 0x1ca PF: > { %p897_p6 = scmp.eq.s32.totalorder %s1483_s15, 1 }
 0x1cb   : > { %v902_v53 = vld [vmem:[#allocation2] sm:$0x1] (%p897_p6) }
 0x1cc   : > { %901 = sbr.rel (!%p897_p6) target bundleno = 491 (0x1eb), region = 48  ;;  %v903_v13 = vmul.f32 (%p897_p6), 0.0025510204, %v902_v53  ;;  %v909_v33 = vld [vmem:[%s2272_s2] sm:$0x1] (%p897_p6) }
 0x1cd   : > { %v914_v9 = vld [vmem:[%s2273_s3] sm:$0x1] (%p897_p6) }
 0x1ce   : > { %v906_v12 = vmul.f32 (%p897_p6), %v903_v13, %v903_v13 }
 0x1d0   : > { %v904_v4 = vld [vmem:[#allocation3] sm:$0x1] (%p897_p6) }
 0x1d1   : > { %v905_v41 = vmul.f32 (%p897_p6), 0.0025510204, %v904_v4 }
 0x1d3   : > { %v907_v49 = vsub.f32 %v905_v41, %v906_v12 }
 0x1d5   : > { %v908_v57 = vmax.f32 %v907_v49, 0.0 }
 0x1d7   : > { %v910_v21 = vadd.f32 1e-05, %v908_v57 }
 0x1d9   : > { %1467 = vrsqrt.f32 %v910_v21 }
 0x1e3   : > { %v1468_v1 = vpop.eup %1467 }
 0x1e4   : > { %v912_v25 = vmul.f32 %v1468_v1, %v909_v33 }
 0x1e6   : > { %913 = vst [vmem:[#allocation4] sm:$0x1] %v912_v25  ;;  %v915_v28 = vmul.f32 %v912_v25, %v903_v13 }
 0x1e8   : > { %v916_v23 = vsub.f32 %v914_v9, %v915_v28 }
 0x1ea   : > { %917 = vst [vmem:[#allocation5] sm:$0x1] %v916_v23 }
 0x1eb PF: > { %p1263_p7 = scmp.ne.s32.totalorder %s1483_s15, 1 }
 0x1ed   : > { %920 = sbr.rel (%p1263_p7) target bundleno = 541 (0x21d), region = 52  ;;  %v1963_v20 = vld [vmem:[#allocation4] ss:$0 sm:$0xff] (!%p1263_p7) }
 0x1ee   : > { %v928_v45 = vmul.f32 (!%p1263_p7), %v1963_v20, %v1707_v30  ;;  %v929_v60 = vmul.f32 (!%p1263_p7), %v1963_v20, %v1711_v34  ;;  %v930_v37 = vmul.f32 (!%p1263_p7), %v1963_v20, %v1715_v38  ;;  %v931_v52 = vmul.f32 (!%p1263_p7), %v1963_v20, %v1719_v42 }
 0x1ef   : > { %v932_v5 = vmul.f32 (!%p1263_p7), %v1963_v20, %v1723_v46  ;;  %v933_v61 = vmul.f32 (!%p1263_p7), %v1963_v20, %v1727_v50  ;;  %v934_v53 = vmul.f32 (!%p1263_p7), %v1963_v20, %v1731_v54  ;;  %v935_v30 = vmul.f32 (!%p1263_p7), %v1963_v20, %v1735_v58 }
 0x1f0   : > { %v936_v25 = vmul.f32 (!%p1263_p7), %v1963_v20, %v1739_v62  ;;  %v937_v9 = vmul.f32 (!%p1263_p7), %v1963_v20, %v1743_v2  ;;  %v938_v28 = vmul.f32 (!%p1263_p7), %v1963_v20, %v1747_v6  ;;  %v939_v23 = vmul.f32 (!%p1263_p7), %v1963_v20, %v1751_v10 }
 0x1f1   : > { %v1965_v29 = vld [vmem:[#allocation5] ss:$0 sm:$0xff] (!%p1263_p7)  ;;  %v940_v62 = vmul.f32 (!%p1263_p7), %v1963_v20, %v1755_v14  ;;  %v941_v2 = vmul.f32 (!%p1263_p7), %v1963_v20, %v1759_v18  ;;  %v942_v6 = vmul.f32 (!%p1263_p7), %v1963_v20, %v1763_v22  ;;  %v943_v10 = vmul.f32 (!%p1263_p7), %v1963_v20, %v1767_v26 }
 0x1f2   : > { %v984_v34 = vadd.f32 (!%p1263_p7), %v1965_v29, %v928_v45  ;;  %v985_v4 = vadd.f32 (!%p1263_p7), %v1965_v29, %v929_v60  ;;  %v986_v38 = vadd.f32 (!%p1263_p7), %v1965_v29, %v930_v37  ;;  %v987_v42 = vadd.f32 (!%p1263_p7), %v1965_v29, %v931_v52 }
 0x1f3   : > { %v988_v13 = vadd.f32 (!%p1263_p7), %v1965_v29, %v932_v5  ;;  %v989_v46 = vadd.f32 (!%p1263_p7), %v1965_v29, %v933_v61  ;;  %v990_v50 = vadd.f32 (!%p1263_p7), %v1965_v29, %v934_v53  ;;  %v991_v41 = vadd.f32 (!%p1263_p7), %v1965_v29, %v935_v30 }
 0x1f4   : > { %v1033_v54 = vmax.f32 %v984_v34, 0.0  ;;  %v1034_v12 = vmax.f32 %v985_v4, 0.0  ;;  %v1035_v49 = vmax.f32 %v986_v38, 0.0  ;;  %v1036_v58 = vmax.f32 %v987_v42, 0.0 }
 0x1f5   : > { %v1037_v57 = vmax.f32 %v988_v13, 0.0  ;;  %v1038_v21 = vmax.f32 %v989_v46, 0.0  ;;  %v1039_v33 = vmax.f32 %v990_v50, 0.0  ;;  %v1040_v1 = vmax.f32 %v991_v41, 0.0 }
 0x1f6   : > { %1082 = vst [vmem:[%s2274_s4] sm:$0xff] %v1033_v54  ;;  %1083 = vst [vmem:[%s2274_s4 + $0x8] sm:$0xff] %v1034_v12  ;;  %v992_v45 = vadd.f32 %v1965_v29, %v936_v25  ;;  %v993_v60 = vadd.f32 %v1965_v29, %v937_v9  ;;  %v994_v37 = vadd.f32 %v1965_v29, %v938_v28 }
 0x1f7   : > { %1084 = vst [vmem:[%s2274_s4 + $0x10] sm:$0xff] %v1035_v49  ;;  %1085 = vst [vmem:[%s2274_s4 + $0x18] sm:$0xff] %v1036_v58  ;;  %v995_v52 = vadd.f32 %v1965_v29, %v939_v23  ;;  %v996_v5 = vadd.f32 %v1965_v29, %v940_v62  ;;  %v997_v14 = vadd.f32 %v1965_v29, %v941_v2 }
 0x1f8   : > { %1086 = vst [vmem:[%s2274_s4 + $0x20] sm:$0xff] %v1037_v57  ;;  %1087 = vst [vmem:[%s2274_s4 + $0x28] sm:$0xff] %v1038_v21  ;;  %v998_v18 = vadd.f32 %v1965_v29, %v942_v6  ;;  %v999_v61 = vadd.f32 %v1965_v29, %v943_v10  ;;  %v1041_v22 = vmax.f32 %v992_v45, 0.0  ;;  %v1042_v53 = vmax.f32 %v993_v60, 0.0 }
 0x1f9   : > { %1088 = vst [vmem:[%s2274_s4 + $0x30] sm:$0xff] %v1039_v33  ;;  %1089 = vst [vmem:[%s2274_s4 + $0x38] sm:$0xff] %v1040_v1  ;;  %v1043_v30 = vmax.f32 %v994_v37, 0.0  ;;  %v1044_v26 = vmax.f32 %v995_v52, 0.0  ;;  %v1045_v34 = vmax.f32 %v996_v5, 0.0  ;;  %v1046_v4 = vmax.f32 %v997_v14, 0.0 }
 0x1fa   : > { %v1047_v38 = vmax.f32 %v998_v18, 0.0  ;;  %v1048_v42 = vmax.f32 %v999_v61, 0.0  ;;  %1090 = vst [vmem:[%s2274_s4 + $0x40] sm:$0xff] %v1041_v22  ;;  %1091 = vst [vmem:[%s2274_s4 + $0x48] sm:$0xff] %v1042_v53  ;;  %v944_v13 = vmul.f32 %v1963_v20, %v1771_v32  ;;  %v945_v46 = vmul.f32 %v1963_v20, %v1775_v40 }
 0x1fb   : > { %1092 = vst [vmem:[%s2274_s4 + $0x50] sm:$0xff] %v1043_v30  ;;  %1093 = vst [vmem:[%s2274_s4 + $0x58] sm:$0xff] %v1044_v26  ;;  %v946_v50 = vmul.f32 %v1963_v20, %v1779_v48  ;;  %v947_v41 = vmul.f32 %v1963_v20, %v1783_v56  ;;  %v948_v32 = vmul.f32 %v1963_v20, %v1787_v0 }
 0x1fc   : > { %1094 = vst [vmem:[%s2274_s4 + $0x60] sm:$0xff] %v1045_v34  ;;  %1095 = vst [vmem:[%s2274_s4 + $0x68] sm:$0xff] %v1046_v4  ;;  %v949_v40 = vmul.f32 %v1963_v20, %v1791_v8  ;;  %v950_v48 = vmul.f32 %v1963_v20, %v1795_v16  ;;  %v951_v56 = vmul.f32 %v1963_v20, %v1799_v24 }
 0x1fd   : > { %1096 = vst [vmem:[%s2274_s4 + $0x70] sm:$0xff] %v1047_v38  ;;  %1097 = vst [vmem:[%s2274_s4 + $0x78] sm:$0xff] %v1048_v42  ;;  %v1000_v54 = vadd.f32 %v1965_v29, %v944_v13  ;;  %v1001_v12 = vadd.f32 %v1965_v29, %v945_v46  ;;  %v1002_v49 = vadd.f32 %v1965_v29, %v946_v50 }
 0x1fe   : > { %v1003_v58 = vadd.f32 %v1965_v29, %v947_v41  ;;  %v1004_v57 = vadd.f32 %v1965_v29, %v948_v32  ;;  %v1005_v0 = vadd.f32 %v1965_v29, %v949_v40  ;;  %v1006_v8 = vadd.f32 %v1965_v29, %v950_v48 }
 0x1ff   : > { %v1007_v21 = vadd.f32 %v1965_v29, %v951_v56  ;;  %v1049_v16 = vmax.f32 %v1000_v54, 0.0  ;;  %v1050_v33 = vmax.f32 %v1001_v12, 0.0  ;;  %v1051_v1 = vmax.f32 %v1002_v49, 0.0 }
 0x200   : > { %v1052_v24 = vmax.f32 %v1003_v58, 0.0  ;;  %v1053_v25 = vmax.f32 %v1004_v57, 0.0  ;;  %v1054_v9 = vmax.f32 %v1005_v0, 0.0  ;;  %v1055_v28 = vmax.f32 %v1006_v8, 0.0  ;;  %v2289_v57 = vld [vmem:[#allocation6_spill] sm:$0xff] }
 0x201   : > { %v1056_v23 = vmax.f32 %v1007_v21, 0.0  ;;  %1098 = vst [vmem:[%s2274_s4 + $0x80] sm:$0xff] %v1049_v16  ;;  %1099 = vst [vmem:[%s2274_s4 + $0x88] sm:$0xff] %v1050_v33  ;;  %v952_v62 = vmul.f32 %v1963_v20, %v1801_v36  ;;  %v953_v2 = vmul.f32 %v1963_v20, %v1803_v44  ;;  %v954_v6 = vmul.f32 %v1963_v20, %v1709_v31  ;;  %v2290_v21 = vld [vmem:[#allocation7_spill] sm:$0xff]  ;;  %v2291_v33 = vld [vmem:[#allocation8_spill] sm:$0xff] }
 0x202   : > { %1100 = vst [vmem:[%s2274_s4 + $0x90] sm:$0xff] %v1051_v1  ;;  %1101 = vst [vmem:[%s2274_s4 + $0x98] sm:$0xff] %v1052_v24  ;;  %v955_v10 = vmul.f32 %v1963_v20, %v1713_v35  ;;  %v956_v31 = vmul.f32 %v1963_v20, %v1717_v39  ;;  %v957_v35 = vmul.f32 %v1963_v20, %v1721_v43 }
 0x203   : > { %1102 = vst [vmem:[%s2274_s4 + $0xa0] sm:$0xff] %v1053_v25  ;;  %1103 = vst [vmem:[%s2274_s4 + $0xa8] sm:$0xff] %v1054_v9  ;;  %v958_v36 = vmul.f32 %v1963_v20, %v1725_v47  ;;  %v959_v44 = vmul.f32 %v1963_v20, %v1729_v51  ;;  %v1008_v45 = vadd.f32 %v1965_v29, %v952_v62  ;;  %v2293_v25 = vld [vmem:[#allocation10_spill] sm:$0xff]  ;;  %v2295_v62 = vld [vmem:[#allocation12_spill] sm:$0xff] }
 0x204   : > { %1104 = vst [vmem:[%s2274_s4 + $0xb0] sm:$0xff] %v1055_v28  ;;  %1105 = vst [vmem:[%s2274_s4 + $0xb8] sm:$0xff] %v1056_v23  ;;  %v1009_v60 = vadd.f32 %v1965_v29, %v953_v2  ;;  %v1010_v37 = vadd.f32 %v1965_v29, %v954_v6  ;;  %v1011_v52 = vadd.f32 %v1965_v29, %v955_v10  ;;  %v2294_v28 = vld [vmem:[#allocation11_spill] sm:$0xff] }
 0x205   : > { %v1012_v5 = vadd.f32 %v1965_v29, %v956_v31  ;;  %v1013_v39 = vadd.f32 %v1965_v29, %v957_v35  ;;  %v1014_v43 = vadd.f32 %v1965_v29, %v958_v36  ;;  %v1015_v14 = vadd.f32 %v1965_v29, %v959_v44 }
 0x206   : > { %v1057_v47 = vmax.f32 %v1008_v45, 0.0  ;;  %v1058_v18 = vmax.f32 %v1009_v60, 0.0  ;;  %v1059_v61 = vmax.f32 %v1010_v37, 0.0  ;;  %v1060_v51 = vmax.f32 %v1011_v52, 0.0 }
 0x207   : > { %v1061_v22 = vmax.f32 %v1012_v5, 0.0  ;;  %v1062_v53 = vmax.f32 %v1013_v39, 0.0  ;;  %v1063_v30 = vmax.f32 %v1014_v43, 0.0  ;;  %v1064_v26 = vmax.f32 %v1015_v14, 0.0 }
 0x208   : > { %1106 = vst [vmem:[%s2274_s4 + $0xc0] sm:$0xff] %v1057_v47  ;;  %1107 = vst [vmem:[%s2274_s4 + $0xc8] sm:$0xff] %v1058_v18  ;;  %v960_v34 = vmul.f32 %v1963_v20, %v1733_v55  ;;  %v961_v4 = vmul.f32 %v1963_v20, %v1737_v59  ;;  %v962_v38 = vmul.f32 %v1963_v20, %v1741_v63 }
 0x209   : > { %1108 = vst [vmem:[%s2274_s4 + $0xd0] sm:$0xff] %v1059_v61  ;;  %1109 = vst [vmem:[%s2274_s4 + $0xd8] sm:$0xff] %v1060_v51  ;;  %v963_v42 = vmul.f32 %v1963_v20, %v1745_v3  ;;  %v964_v55 = vmul.f32 %v1963_v20, %v1749_v7  ;;  %v965_v59 = vmul.f32 %v1963_v20, %v1753_v11 }
 0x20a   : > { %1110 = vst [vmem:[%s2274_s4 + $0xe0] sm:$0xff] %v1061_v22  ;;  %1111 = vst [vmem:[%s2274_s4 + $0xe8] sm:$0xff] %v1062_v53  ;;  %v966_v63 = vmul.f32 %v1963_v20, %v1757_v15  ;;  %v967_v3 = vmul.f32 %v1963_v20, %v1761_v19  ;;  %v1016_v13 = vadd.f32 %v1965_v29, %v960_v34 }
 0x20b   : > { %1112 = vst [vmem:[%s2274_s4 + $0xf0] sm:$0xff] %v1063_v30  ;;  %1113 = vst [vmem:[%s2274_s4 + $0xf8] sm:$0xff] %v1064_v26  ;;  %v1017_v46 = vadd.f32 %v1965_v29, %v961_v4  ;;  %v1018_v50 = vadd.f32 %v1965_v29, %v962_v38  ;;  %v1019_v41 = vadd.f32 %v1965_v29, %v963_v42 }
 0x20c   : > { %v1020_v32 = vadd.f32 %v1965_v29, %v964_v55  ;;  %v1021_v7 = vadd.f32 %v1965_v29, %v965_v59  ;;  %v1022_v11 = vadd.f32 %v1965_v29, %v966_v63  ;;  %v1023_v40 = vadd.f32 %v1965_v29, %v967_v3 }
 0x20d   : > { %v1065_v15 = vmax.f32 %v1016_v13, 0.0  ;;  %v1066_v48 = vmax.f32 %v1017_v46, 0.0  ;;  %v1067_v56 = vmax.f32 %v1018_v50, 0.0  ;;  %v1068_v19 = vmax.f32 %v1019_v41, 0.0 }
 0x20e   : > { %v1069_v54 = vmax.f32 %v1020_v32, 0.0  ;;  %v1070_v12 = vmax.f32 %v1021_v7, 0.0  ;;  %v1071_v49 = vmax.f32 %v1022_v11, 0.0  ;;  %v1072_v58 = vmax.f32 %v1023_v40, 0.0 }
 0x20f   : > { %1114 = vst [vmem:[%s2274_s4 + $0x100] sm:$0xff] %v1065_v15  ;;  %1115 = vst [vmem:[%s2274_s4 + $0x108] sm:$0xff] %v1066_v48  ;;  %v968_v0 = vmul.f32 %v1963_v20, %v2289_v57  ;;  %v969_v8 = vmul.f32 %v1963_v20, %v1769_v27  ;;  %v970_v16 = vmul.f32 %v1963_v20, %v2290_v21  ;;  %v2292_v27 = vld [vmem:[#allocation9_spill] sm:$0xff] }
 0x210   : > { %1116 = vst [vmem:[%s2274_s4 + $0x110] sm:$0xff] %v1067_v56  ;;  %1117 = vst [vmem:[%s2274_s4 + $0x118] sm:$0xff] %v1068_v19  ;;  %v971_v1 = vmul.f32 %v1963_v20, %v2291_v33  ;;  %v972_v24 = vmul.f32 %v1963_v20, %v2292_v27  ;;  %v973_v9 = vmul.f32 %v1963_v20, %v2293_v25 }
 0x211   : > { %1118 = vst [vmem:[%s2274_s4 + $0x120] sm:$0xff] %v1069_v54  ;;  %1119 = vst [vmem:[%s2274_s4 + $0x128] sm:$0xff] %v1070_v12  ;;  %v974_v23 = vmul.f32 %v1963_v20, %v2294_v28  ;;  %v975_v2 = vmul.f32 %v1963_v20, %v2295_v62  ;;  %v1024_v6 = vadd.f32 %v1965_v29, %v968_v0 }
 0x212   : > { %1120 = vst [vmem:[%s2274_s4 + $0x130] sm:$0xff] %v1071_v49  ;;  %1121 = vst [vmem:[%s2274_s4 + $0x138] sm:$0xff] %v1072_v58  ;;  %v1025_v10 = vadd.f32 %v1965_v29, %v969_v8  ;;  %v1026_v31 = vadd.f32 %v1965_v29, %v970_v16  ;;  %v1027_v35 = vadd.f32 %v1965_v29, %v971_v1 }
 0x213   : > { %v1028_v36 = vadd.f32 %v1965_v29, %v972_v24  ;;  %v1029_v44 = vadd.f32 %v1965_v29, %v973_v9  ;;  %v1030_v45 = vadd.f32 %v1965_v29, %v974_v23  ;;  %v1031_v60 = vadd.f32 %v1965_v29, %v975_v2 }
 0x214   : > { %v1073_v37 = vmax.f32 %v1024_v6, 0.0  ;;  %v1074_v52 = vmax.f32 %v1025_v10, 0.0  ;;  %v1075_v5 = vmax.f32 %v1026_v31, 0.0  ;;  %v1076_v39 = vmax.f32 %v1027_v35, 0.0 }
 0x215   : > { %v1077_v43 = vmax.f32 %v1028_v36, 0.0  ;;  %v1078_v14 = vmax.f32 %v1029_v44, 0.0  ;;  %v1079_v47 = vmax.f32 %v1030_v45, 0.0  ;;  %v1080_v18 = vmax.f32 %v1031_v60, 0.0 }
 0x216   : > { %1122 = vst [vmem:[%s2274_s4 + $0x140] sm:$0xff] %v1073_v37  ;;  %1123 = vst [vmem:[%s2274_s4 + $0x148] sm:$0xff] %v1074_v52  ;;  %v976_v61 = vmul.f32 %v1963_v20, %v1797_v17 }
 0x217   : > { %1124 = vst [vmem:[%s2274_s4 + $0x150] sm:$0xff] %v1075_v5  ;;  %1125 = vst [vmem:[%s2274_s4 + $0x158] sm:$0xff] %v1076_v39 }
 0x218   : > { %1126 = vst [vmem:[%s2274_s4 + $0x160] sm:$0xff] %v1077_v43  ;;  %1127 = vst [vmem:[%s2274_s4 + $0x168] sm:$0xff] %v1078_v14  ;;  %v1032_v51 = vadd.f32 %v1965_v29, %v976_v61 }
 0x219   : > { %1128 = vst [vmem:[%s2274_s4 + $0x170] sm:$0xff] %v1079_v47  ;;  %1129 = vst [vmem:[%s2274_s4 + $0x178] sm:$0xff] %v1080_v18 }
 0x21a   : > { %v1081_v22 = vmax.f32 %v1032_v51, 0.0 }
 0x21c   : > { %1130 = vst [vmem:[%s2274_s4 + $0x180] sm:$0xff] %v1081_v22 }
 0x21d PF: > { %s14_s17 = sadd.s32 1, %s1491_s17   ;;  %s2296_s15 = smov %s1487_s16 }
 0x21e   : > { %p11_p8 = scmp.ge.s32.totalorder %s14_s17, 4   ;;  %s2297_s16 = smov %s2299_s18 }
 0x220   :  { %13 = sbr.rel (!%p11_p8) target bundleno = 2 (0x2), region = 82 }

</bundles_post_ra>
